<compile_context>
chip_gen: v6e
topology: v6e:2x2x1
jax: 0.10.0
libtpu: 0.0.40
codegen_flags: <defaults>
</compile_context>

<pallas_src>
import jax
import jax.numpy as jnp
from jax.experimental import pallas as pl
from jax.experimental.pallas import tpu as pltpu


def _round_up_lanes(x, lanes=128):
    return ((x + lanes - 1) // lanes) * lanes


def _pad_to(x, shape):
    pads = [(0, t - s) for s, t in zip(x.shape, shape)]
    if all(p == (0, 0) for p in pads):
        return x
    return jnp.pad(x, pads)


def _full_spec(shape):
    ndim = len(shape)
    return pl.BlockSpec(shape, lambda i, _n=ndim: (0,) * _n)


# --------------------------- fused HierGCN kernel -----------------------------
def _hier_gcn_fused_kernel(a_ref, x_ref,
                           w1m_ref, b1m_ref, w2m_ref, b2m_ref,
                           wg1_ref, bg1_ref, wg2_ref, bg2_ref,
                           local_ref, global_ref, emb_ref):
    x = x_ref[...]          # (N, F)
    a = a_ref[...]          # (N, N) normalized adjacency

    # ---- local MLP: relu(X W1 + b1) W2 + b2  (lane-padded weights) ----------
    h1 = jnp.maximum(
        jnp.dot(x, w1m_ref[...], preferred_element_type=jnp.float32) + b1m_ref[...],
        0.0)                                                        # (N, H_PAD)
    local_ref[...] = (
        jnp.dot(h1, w2m_ref[...], preferred_element_type=jnp.float32) + b2m_ref[...]
    ).astype(local_ref.dtype)                                       # (N, C_PAD)

    # ---- global GCN layer 1: relu((A X) Wg1 + bg1)  (F < H -> cheap order) --
    agg = jnp.dot(a, x, preferred_element_type=jnp.float32)         # (N, F)
    h = jnp.maximum(
        jnp.dot(agg, wg1_ref[...], preferred_element_type=jnp.float32) + bg1_ref[...],
        0.0)                                                        # (N, H_PAD)
    emb_ref[...] = h.astype(emb_ref.dtype)

    # ---- global GCN layer 2 (reordered): A (h Wg2) + bg2 --------------------
    z = jnp.dot(h, wg2_ref[...], preferred_element_type=jnp.float32)  # (N, C_PAD)
    global_ref[...] = (
        jnp.dot(a, z, preferred_element_type=jnp.float32) + bg2_ref[...]
    ).astype(global_ref.dtype)


def hier_gcn_forward(features, a_hat, params):
    n, fin = features.shape
    h_feats = params["mlp_w1"].shape[1]
    num_classes = params["mlp_w2"].shape[1]
    h_pad = _round_up_lanes(h_feats)
    c_pad = _round_up_lanes(num_classes)

    # Zero-pad hidden/class dims to 128 lanes so every kernel store is dense.
    w1m = _pad_to(params["mlp_w1"], (fin, h_pad))
    b1m = _pad_to(params["mlp_b1"], (1, h_pad))
    w2m = _pad_to(params["mlp_w2"], (h_pad, c_pad))
    b2m = _pad_to(params["mlp_b2"], (1, c_pad))
    wg1 = _pad_to(params["gcn_w1"], (fin, h_pad))
    bg1 = _pad_to(params["gcn_b1"], (1, h_pad))
    wg2 = _pad_to(params["gcn_w2"], (h_pad, c_pad))
    bg2 = _pad_to(params["gcn_b2"], (1, c_pad))

    out_shapes = (
        jax.ShapeDtypeStruct((n, c_pad), jnp.float32),  # local logits (padded)
        jax.ShapeDtypeStruct((n, c_pad), jnp.float32),  # global logits (padded)
        jax.ShapeDtypeStruct((n, h_pad), jnp.float32),  # global embeddings (padded)
    )

    local_pad, global_pad, emb_pad = pl.pallas_call(
        _hier_gcn_fused_kernel,
        out_shape=out_shapes,
        grid_spec=pltpu.PrefetchScalarGridSpec(
            num_scalar_prefetch=0,
            grid=(1,),  # whole problem is VMEM-resident at these sizes
            in_specs=[
                _full_spec((n, n)),          # A_hat
                _full_spec((n, fin)),        # X
                _full_spec((fin, h_pad)),    # mlp W1
                _full_spec((1, h_pad)),      # mlp b1
                _full_spec((h_pad, c_pad)),  # mlp W2
                _full_spec((1, c_pad)),      # mlp b2
                _full_spec((fin, h_pad)),    # gcn W1
                _full_spec((1, h_pad)),      # gcn b1
                _full_spec((h_pad, c_pad)),  # gcn W2
                _full_spec((1, c_pad)),      # gcn b2
            ],
            out_specs=[
                _full_spec((n, c_pad)),
                _full_spec((n, c_pad)),
                _full_spec((n, h_pad)),
            ],
        ),
        compiler_params=pltpu.CompilerParams(
            dimension_semantics=("arbitrary",),
        ),
    )(a_hat, features, w1m, b1m, w2m, b2m, wg1, bg1, wg2, bg2)

    local_logits = local_pad[:, :num_classes]
    global_logits = global_pad[:, :num_classes]
    global_embeddings = emb_pad[:, :h_feats]
    return local_logits, global_logits, global_embeddings


# ----------------------------------- setup ------------------------------------
def make_normalized_adjacency(key, n, p=0.1):
    a = (jax.random.uniform(key, (n, n)) < p).astype(jnp.float32)
    a = jnp.maximum(a, a.T)                         # symmetrize
    a = a + jnp.eye(n, dtype=jnp.float32)           # self loops
    deg = jnp.sum(a, axis=1)
    d_inv_sqrt = 1.0 / jnp.sqrt(deg)
    return a * d_inv_sqrt[:, None] * d_inv_sqrt[None, :]


def init_params(key, in_feats, h_feats, num_classes):
    ks = jax.random.split(key, 4)
    s_in = 1.0 / jnp.sqrt(jnp.float32(in_feats))
    s_h = 1.0 / jnp.sqrt(jnp.float32(h_feats))
    return {
        "mlp_w1": jax.random.normal(ks[0], (in_feats, h_feats), jnp.float32) * s_in,
        "mlp_b1": jnp.zeros((1, h_feats), jnp.float32),
        "mlp_w2": jax.random.normal(ks[1], (h_feats, num_classes), jnp.float32) * s_h,
        "mlp_b2": jnp.zeros((1, num_classes), jnp.float32),
        "gcn_w1": jax.random.normal(ks[2], (in_feats, h_feats), jnp.float32) * s_in,
        "gcn_b1": jnp.zeros((1, h_feats), jnp.float32),
        "gcn_w2": jax.random.normal(ks[3], (h_feats, num_classes), jnp.float32) * s_h,
        "gcn_b2": jnp.zeros((1, num_classes), jnp.float32),
    }


if __name__ == "__main__":
    N = 128          # number of graph nodes
    IN_FEATS = 32    # input feature dim
    H_FEATS = 64     # hidden dim (h_feats in the reference)
    NUM_CLASSES = 2

    root = jax.random.PRNGKey(0)
    k_feat, k_adj, k_par = jax.random.split(root, 3)

    features = jax.random.normal(k_feat, (N, IN_FEATS), jnp.float32)
    a_hat = make_normalized_adjacency(k_adj, N)
    params = init_params(k_par, IN_FEATS, H_FEATS, NUM_CLASSES)

    local_logits, global_logits, global_emb = jax.block_until_ready(
        hier_gcn_forward(features, a_hat, params)
    )

    # reference check in plain JAX
    ref_local = (
        jnp.maximum(features @ params["mlp_w1"] + params["mlp_b1"], 0.0)
        @ params["mlp_w2"] + params["mlp_b2"]
    )
    ref_h = jnp.maximum(a_hat @ features @ params["gcn_w1"] + params["gcn_b1"], 0.0)
    ref_global = a_hat @ ref_h @ params["gcn_w2"] + params["gcn_b2"]

    assert local_logits.shape == (N, NUM_CLASSES)
    assert global_logits.shape == (N, NUM_CLASSES)
    assert global_emb.shape == (N, H_FEATS)
    assert jnp.allclose(local_logits, ref_local, atol=2e-4, rtol=1e-3)
    assert jnp.allclose(global_emb, ref_h, atol=2e-4, rtol=1e-3)
    assert jnp.allclose(global_logits, ref_global, atol=2e-4, rtol=1e-3)

    print("KERNEL_OK")
</pallas_src>

<mosaic_0001>
module attributes {stable_mosaic.version = 11 : i64} {
  func.func @_hier_gcn_fused_kernel(%arg0: i32, %arg1: memref<128x128xf32, #tpu.memory_space<vmem>>, %arg2: memref<128x32xf32, #tpu.memory_space<vmem>>, %arg3: memref<32x128xf32, #tpu.memory_space<vmem>>, %arg4: memref<1x128xf32, #tpu.memory_space<vmem>>, %arg5: memref<128x128xf32, #tpu.memory_space<vmem>>, %arg6: memref<1x128xf32, #tpu.memory_space<vmem>>, %arg7: memref<32x128xf32, #tpu.memory_space<vmem>>, %arg8: memref<1x128xf32, #tpu.memory_space<vmem>>, %arg9: memref<128x128xf32, #tpu.memory_space<vmem>>, %arg10: memref<1x128xf32, #tpu.memory_space<vmem>>, %arg11: memref<128x128xf32, #tpu.memory_space<vmem>>, %arg12: memref<128x128xf32, #tpu.memory_space<vmem>>, %arg13: memref<128x128xf32, #tpu.memory_space<vmem>>) attributes {dimension_semantics = [#tpu.dimension_semantics<arbitrary>], iteration_bounds = array<i64: 1>, scalar_prefetch = 0 : i64, scratch_operands = 0 : i64, tpu.core_type = #tpu.core_type<tc>, window_params = [{pipeline_mode = #tpu.pipeline_mode<synchronous>, transform_indices = @transform_0, window_bounds = array<i64: 128, 128>}, {pipeline_mode = #tpu.pipeline_mode<synchronous>, transform_indices = @transform_1, window_bounds = array<i64: 128, 32>}, {pipeline_mode = #tpu.pipeline_mode<synchronous>, transform_indices = @transform_2, window_bounds = array<i64: 32, 128>}, {pipeline_mode = #tpu.pipeline_mode<synchronous>, transform_indices = @transform_3, window_bounds = array<i64: 1, 128>}, {pipeline_mode = #tpu.pipeline_mode<synchronous>, transform_indices = @transform_4, window_bounds = array<i64: 128, 128>}, {pipeline_mode = #tpu.pipeline_mode<synchronous>, transform_indices = @transform_5, window_bounds = array<i64: 1, 128>}, {pipeline_mode = #tpu.pipeline_mode<synchronous>, transform_indices = @transform_6, window_bounds = array<i64: 32, 128>}, {pipeline_mode = #tpu.pipeline_mode<synchronous>, transform_indices = @transform_7, window_bounds = array<i64: 1, 128>}, {pipeline_mode = #tpu.pipeline_mode<synchronous>, transform_indices = @transform_8, window_bounds = array<i64: 128, 128>}, {pipeline_mode = #tpu.pipeline_mode<synchronous>, transform_indices = @transform_9, window_bounds = array<i64: 1, 128>}, {pipeline_mode = #tpu.pipeline_mode<synchronous>, transform_indices = @transform_10, window_bounds = array<i64: 128, 128>}, {pipeline_mode = #tpu.pipeline_mode<synchronous>, transform_indices = @transform_11, window_bounds = array<i64: 128, 128>}, {pipeline_mode = #tpu.pipeline_mode<synchronous>, transform_indices = @transform_12, window_bounds = array<i64: 128, 128>}]} {
    %c0 = arith.constant 0 : index
    %c0_0 = arith.constant 0 : index
    %0 = vector.load %arg2[%c0, %c0_0] : memref<128x32xf32, #tpu.memory_space<vmem>>, vector<128x32xf32>
    %c0_1 = arith.constant 0 : index
    %c0_2 = arith.constant 0 : index
    %1 = vector.load %arg1[%c0_1, %c0_2] : memref<128x128xf32, #tpu.memory_space<vmem>>, vector<128x128xf32>
    %c0_3 = arith.constant 0 : index
    %c0_4 = arith.constant 0 : index
    %2 = vector.load %arg3[%c0_3, %c0_4] : memref<32x128xf32, #tpu.memory_space<vmem>>, vector<32x128xf32>
    %cst = arith.constant dense<0.000000e+00> : vector<128x128xf32>
    %3 = tpu.matmul %0, %2, %cst {dimension_numbers = #tpu.dot_dimension_numbers<[1], [0], [0], [1], [0, 0, 1, 1], [], []>} : vector<128x32xf32>, vector<32x128xf32>, vector<128x128xf32> -> vector<128x128xf32>
    %c0_5 = arith.constant 0 : index
    %c0_6 = arith.constant 0 : index
    %4 = vector.load %arg4[%c0_5, %c0_6] : memref<1x128xf32, #tpu.memory_space<vmem>>, vector<1x128xf32>
    %5 = vector.broadcast %4 : vector<1x128xf32> to vector<128x128xf32>
    %6 = arith.addf %3, %5 : vector<128x128xf32>
    %cst_7 = arith.constant 0.000000e+00 : f32
    %7 = vector.broadcast %cst_7 : f32 to vector<128x128xf32>
    %8 = arith.maximumf %6, %7 : vector<128x128xf32>
    %c0_8 = arith.constant 0 : index
    %c0_9 = arith.constant 0 : index
    %9 = vector.load %arg5[%c0_8, %c0_9] : memref<128x128xf32, #tpu.memory_space<vmem>>, vector<128x128xf32>
    %cst_10 = arith.constant dense<0.000000e+00> : vector<128x128xf32>
    %10 = tpu.matmul %8, %9, %cst_10 {dimension_numbers = #tpu.dot_dimension_numbers<[1], [0], [0], [1], [0, 0, 1, 1], [], []>} : vector<128x128xf32>, vector<128x128xf32>, vector<128x128xf32> -> vector<128x128xf32>
    %c0_11 = arith.constant 0 : index
    %c0_12 = arith.constant 0 : index
    %11 = vector.load %arg6[%c0_11, %c0_12] : memref<1x128xf32, #tpu.memory_space<vmem>>, vector<1x128xf32>
    %12 = vector.broadcast %11 : vector<1x128xf32> to vector<128x128xf32>
    %13 = arith.addf %10, %12 : vector<128x128xf32>
    %c0_13 = arith.constant 0 : index
    %c0_14 = arith.constant 0 : index
    %14 = vector.load %arg11[%c0_13, %c0_14] : memref<128x128xf32, #tpu.memory_space<vmem>>, vector<128x128xf32>
    tpu.vector_store %arg11[%c0_13, %c0_14], %13 {strides = array<i32>} : memref<128x128xf32, #tpu.memory_space<vmem>>, vector<128x128xf32>,
    %cst_15 = arith.constant dense<0.000000e+00> : vector<128x32xf32>
    %15 = tpu.matmul %1, %0, %cst_15 {dimension_numbers = #tpu.dot_dimension_numbers<[1], [0], [0], [1], [0, 0, 1, 1], [], []>} : vector<128x128xf32>, vector<128x32xf32>, vector<128x32xf32> -> vector<128x32xf32>
    %c0_16 = arith.constant 0 : index
    %c0_17 = arith.constant 0 : index
    %16 = vector.load %arg7[%c0_16, %c0_17] : memref<32x128xf32, #tpu.memory_space<vmem>>, vector<32x128xf32>
    %cst_18 = arith.constant dense<0.000000e+00> : vector<128x128xf32>
    %17 = tpu.matmul %15, %16, %cst_18 {dimension_numbers = #tpu.dot_dimension_numbers<[1], [0], [0], [1], [0, 0, 1, 1], [], []>} : vector<128x32xf32>, vector<32x128xf32>, vector<128x128xf32> -> vector<128x128xf32>
    %c0_19 = arith.constant 0 : index
    %c0_20 = arith.constant 0 : index
    %18 = vector.load %arg8[%c0_19, %c0_20] : memref<1x128xf32, #tpu.memory_space<vmem>>, vector<1x128xf32>
    %19 = vector.broadcast %18 : vector<1x128xf32> to vector<128x128xf32>
    %20 = arith.addf %17, %19 : vector<128x128xf32>
    %cst_21 = arith.constant 0.000000e+00 : f32
    %21 = vector.broadcast %cst_21 : f32 to vector<128x128xf32>
    %22 = arith.maximumf %20, %21 : vector<128x128xf32>
    %c0_22 = arith.constant 0 : index
    %c0_23 = arith.constant 0 : index
    %23 = vector.load %arg13[%c0_22, %c0_23] : memref<128x128xf32, #tpu.memory_space<vmem>>, vector<128x128xf32>
    tpu.vector_store %arg13[%c0_22, %c0_23], %22 {strides = array<i32>} : memref<128x128xf32, #tpu.memory_space<vmem>>, vector<128x128xf32>,
    %c0_24 = arith.constant 0 : index
    %c0_25 = arith.constant 0 : index
    %24 = vector.load %arg9[%c0_24, %c0_25] : memref<128x128xf32, #tpu.memory_space<vmem>>, vector<128x128xf32>
    %cst_26 = arith.constant dense<0.000000e+00> : vector<128x128xf32>
    %25 = tpu.matmul %22, %24, %cst_26 {dimension_numbers = #tpu.dot_dimension_numbers<[1], [0], [0], [1], [0, 0, 1, 1], [], []>} : vector<128x128xf32>, vector<128x128xf32>, vector<128x128xf32> -> vector<128x128xf32>
    %cst_27 = arith.constant dense<0.000000e+00> : vector<128x128xf32>
    %26 = tpu.matmul %1, %25, %cst_27 {dimension_numbers = #tpu.dot_dimension_numbers<[1], [0], [0], [1], [0, 0, 1, 1], [], []>} : vector<128x128xf32>, vector<128x128xf32>, vector<128x128xf32> -> vector<128x128xf32>
    %c0_28 = arith.constant 0 : index
    %c0_29 = arith.constant 0 : index
    %27 = vector.load %arg10[%c0_28, %c0_29] : memref<1x128xf32, #tpu.memory_space<vmem>>, vector<1x128xf32>
    %28 = vector.broadcast %27 : vector<1x128xf32> to vector<128x128xf32>
    %29 = arith.addf %26, %28 : vector<128x128xf32>
    %c0_30 = arith.constant 0 : index
    %c0_31 = arith.constant 0 : index
    %30 = vector.load %arg12[%c0_30, %c0_31] : memref<128x128xf32, #tpu.memory_space<vmem>>, vector<128x128xf32>
    tpu.vector_store %arg12[%c0_30, %c0_31], %29 {strides = array<i32>} : memref<128x128xf32, #tpu.memory_space<vmem>>, vector<128x128xf32>,
    return
  }
  func.func @transform_0(%arg0: i32) -> (i32, i32) {
    %c0_i32 = arith.constant 0 : i32
    %c0_i32_0 = arith.constant 0 : i32
    %c0_i32_1 = arith.constant 0 : i32
    return %c0_i32, %c0_i32_0 : i32, i32
  }
  func.func @transform_1(%arg0: i32) -> (i32, i32) {
    %c0_i32 = arith.constant 0 : i32
    %c0_i32_0 = arith.constant 0 : i32
    %c0_i32_1 = arith.constant 0 : i32
    return %c0_i32, %c0_i32_0 : i32, i32
  }
  func.func @transform_2(%arg0: i32) -> (i32, i32) {
    %c0_i32 = arith.constant 0 : i32
    %c0_i32_0 = arith.constant 0 : i32
    %c0_i32_1 = arith.constant 0 : i32
    return %c0_i32, %c0_i32_0 : i32, i32
  }
  func.func @transform_3(%arg0: i32) -> (i32, i32) {
    %c0_i32 = arith.constant 0 : i32
    %c0_i32_0 = arith.constant 0 : i32
    %c0_i32_1 = arith.constant 0 : i32
    return %c0_i32, %c0_i32_0 : i32, i32
  }
  func.func @transform_4(%arg0: i32) -> (i32, i32) {
    %c0_i32 = arith.constant 0 : i32
    %c0_i32_0 = arith.constant 0 : i32
    %c0_i32_1 = arith.constant 0 : i32
    return %c0_i32, %c0_i32_0 : i32, i32
  }
  func.func @transform_5(%arg0: i32) -> (i32, i32) {
    %c0_i32 = arith.constant 0 : i32
    %c0_i32_0 = arith.constant 0 : i32
    %c0_i32_1 = arith.constant 0 : i32
    return %c0_i32, %c0_i32_0 : i32, i32
  }
  func.func @transform_6(%arg0: i32) -> (i32, i32) {
    %c0_i32 = arith.constant 0 : i32
    %c0_i32_0 = arith.constant 0 : i32
    %c0_i32_1 = arith.constant 0 : i32
    return %c0_i32, %c0_i32_0 : i32, i32
  }
  func.func @transform_7(%arg0: i32) -> (i32, i32) {
    %c0_i32 = arith.constant 0 : i32
    %c0_i32_0 = arith.constant 0 : i32
    %c0_i32_1 = arith.constant 0 : i32
    return %c0_i32, %c0_i32_0 : i32, i32
  }
  func.func @transform_8(%arg0: i32) -> (i32, i32) {
    %c0_i32 = arith.constant 0 : i32
    %c0_i32_0 = arith.constant 0 : i32
    %c0_i32_1 = arith.constant 0 : i32
    return %c0_i32, %c0_i32_0 : i32, i32
  }
  func.func @transform_9(%arg0: i32) -> (i32, i32) {
    %c0_i32 = arith.constant 0 : i32
    %c0_i32_0 = arith.constant 0 : i32
    %c0_i32_1 = arith.constant 0 : i32
    return %c0_i32, %c0_i32_0 : i32, i32
  }
  func.func @transform_10(%arg0: i32) -> (i32, i32) {
    %c0_i32 = arith.constant 0 : i32
    %c0_i32_0 = arith.constant 0 : i32
    %c0_i32_1 = arith.constant 0 : i32
    return %c0_i32, %c0_i32_0 : i32, i32
  }
  func.func @transform_11(%arg0: i32) -> (i32, i32) {
    %c0_i32 = arith.constant 0 : i32
    %c0_i32_0 = arith.constant 0 : i32
    %c0_i32_1 = arith.constant 0 : i32
    return %c0_i32, %c0_i32_0 : i32, i32
  }
  func.func @transform_12(%arg0: i32) -> (i32, i32) {
    %c0_i32 = arith.constant 0 : i32
    %c0_i32_0 = arith.constant 0 : i32
    %c0_i32_1 = arith.constant 0 : i32
    return %c0_i32, %c0_i32_0 : i32, i32
  }
}

</mosaic_0001>

<bundles_post_ra>
// kernel: tpu_custom_call.1
= control target key start
LH: loop header
LB: loop body
LE: loop exit
PB: predicated region body
PF: predicated region fallthrough
CT: control target
= control target key end

     0   :  { %18 = vsyncpa [#allocation3], 0  ;;  %s2347_s0 = inlined_call_operand.vmem [shape: f32[128,128], index: 0, kind: input, shape index: {}]   ;;  %s2348_s1 = inlined_call_operand.vmem [shape: f32[128,32], index: 1, kind: input, shape index: {}]   ;;  %s2349_s2 = inlined_call_operand.vmem [shape: f32[32,128], index: 2, kind: input, shape index: {}]   ;;  %s2350_s3 = inlined_call_operand.vmem [shape: f32[1,128], index: 3, kind: input, shape index: {}]   ;;  %s2351_s4 = inlined_call_operand.hbm [shape: f32[128,128], index: 4, kind: input, shape index: {}]   ;;  %s2352_s5 = inlined_call_operand.vmem [shape: f32[1,128], index: 5, kind: input, shape index: {}]   ;;  %s2353_s6 = inlined_call_operand.hbm [shape: f32[32,128], index: 6, kind: input, shape index: {}]   ;;  %s2354_s7 = inlined_call_operand.vmem [shape: f32[1,128], index: 7, kind: input, shape index: {}]   ;;  %s2355_s8 = inlined_call_operand.hbm [shape: f32[128,128], index: 8, kind: input, shape index: {}]   ;;  %s2356_s9 = inlined_call_operand.vmem [shape: f32[1,128], index: 9, kind: input, shape index: {}]   ;;  %s2357_s10 = inlined_call_operand.hbm [shape: f32[128,128], index: 10, kind: output, shape index: {0}]   ;;  %s2358_s11 = inlined_call_operand.hbm [shape: f32[128,128], index: 11, kind: output, shape index: {1}]   ;;  %s2359_s12 = inlined_call_operand.hbm [shape: f32[128,128], index: 12, kind: output, shape index: {2}]  }
   0x1   :  { %19 = vsyncpa [#allocation6], 0 }
   0x2   :  { %20 = vsyncpa [#allocation4], 0 }
   0x3   :  { %21 = vsyncpa [#allocation10], 0  ;;  %s1937_s21 = smov [#allocation5]   ;;  %s1938_s23 = smov [#allocation2]  }
   0x4   :  { %s49_s22 = sshll.u32 %s1937_s21, 4  ;;  %s35_s24 = sshll.u32 %s1938_s23, 4  ;;  %s50_s22 = int_to_ptr.vmem [resolvable:$true] %s49_s22  ;;  %s36_s24 = int_to_ptr.vmem [resolvable:$true] %s35_s24 }
   0x5   :  { %s1817_s25 = scalar_lea.vmem %s50_s22, 512  ;;  %p1822_p1 = scmp.lt.s32.totalorder %s50_s22, %s50_s22 }
   0x6   :  { %p1818_p0 = scmp.ne.s32.totalorder %s50_s22, %s1817_s25  ;;  %p1823_p2 = scmp.lt.s32.totalorder %s1817_s25, %s1817_s25 }
   0x8   :  { %p1824_p3 = por %p1823_p2, %p1822_p1 }
   0xa   :  { %p1825_p4 = pnand %p1824_p3, %p1818_p0 }
   0xc   :  { %1828 = shalt.err (!%p1825_p4)
}
   0xd   :  { %s1939_s26 = smov 128   ;;  %s1940_s27 = smov 8  }
   0xe   :  { %55 = dma.hbm_to_vmem [thread:$0]  %s2353_s6, 512, %s50_s22, [#allocation6], %s1939_s26, %s1939_s26, %s1940_s27  }
   0xf   :  { %s1837_s30 = scalar_lea.vmem %s36_s24, 2048  ;;  %p1842_p6 = scmp.lt.s32.totalorder %s36_s24, %s36_s24 }
  0x10   :  { %p1838_p5 = scmp.ne.s32.totalorder %s36_s24, %s1837_s30  ;;  %p1843_p7 = scmp.lt.s32.totalorder %s1837_s30, %s1837_s30 }
  0x12   :  { %p1844_p8 = por %p1843_p7, %p1842_p6 }
  0x14   :  { %p1845_p9 = pnand %p1844_p8, %p1838_p5 }
  0x16   :  { %1848 = shalt.err (!%p1845_p9)
}
  0x17   :  { %41 = dma.hbm_to_vmem [thread:$0]  %s2351_s4, 2048, %s36_s24, [#allocation3], %s1939_s26, %s1939_s26, %s1940_s27  }
  0x18   :  { %s1941_s15 = smov [#allocation7]  }
  0x19   :  { %s63_s16 = sshll.u32 %s1941_s15, 4  ;;  %s64_s16 = int_to_ptr.vmem [resolvable:$true] %s63_s16 }
  0x1a   :  { %s1857_s17 = scalar_lea.vmem %s64_s16, 2048  ;;  %p1862_p11 = scmp.lt.s32.totalorder %s64_s16, %s64_s16 }
  0x1b   :  { %p1858_p10 = scmp.ne.s32.totalorder %s64_s16, %s1857_s17  ;;  %p1863_p12 = scmp.lt.s32.totalorder %s1857_s17, %s1857_s17 }
  0x1d   :  { %p1864_p13 = por %p1863_p12, %p1862_p11 }
  0x1f   :  { %p1865_p0 = pnand %p1864_p13, %p1858_p10 }
  0x21   :  { %1868 = shalt.err (!%p1865_p0)
}
  0x22   :  { %69 = dma.hbm_to_vmem [thread:$0]  %s2355_s8, 2048, %s64_s16, [#allocation6], %s1939_s26, %s1939_s26, %s1940_s27  }
  0x23   :  { %1929 = dma.done.wait [#allocation3], 2048  }
  0x24   :  { %1930 = vsyncadd [#allocation3], 4294965248 }
  0x25   :  { %1931 = dma.done.wait [#allocation6], 2560  }
  0x26   :  { %1932 = vsyncadd [#allocation6], 4294964736  ;;  %vm124_vm0 = vcmask 261120   ;;  %v116_v0 = vld [vmem:[%s2349_s2 + $0x18] sm:$0xff]  ;;  %v115_v1 = vld [vmem:[%s2349_s2 + $0x10] sm:$0xff] }
  0x27   :  { %1481 = vmatprep.subr.mxu0 %v116_v0  ;;  %v2037_v2 = vld [vmem:[%s2348_s1] sm:$0xff]  ;;  %v114_v3 = vld [vmem:[%s2349_s2 + $0x8] sm:$0xff]  ;;  %v2055_v6 = vld [vmem:[%s2348_s1 + $0x78] sm:$0xff] }
  0x28   :  { %1482 = vmatpush3.msra.mxu0 %v116_v0  ;;  %1489 = vmatprep.mubr.msk.f32.mxu0 %vm124_vm0, %v2037_v2  ;;  %v113_v4 = vld [vmem:[%s2349_s2] sm:$0xff]  ;;  %v2050_v5 = vld [vmem:[%s2348_s1 + $0x8] sm:$0xff]  ;;  %v2060_v7 = vld [vmem:[%s2348_s1 + $0x10] sm:$0xff] }
  0x29   :  { %1483 = vmatprep.subr.mxu0 %v115_v1  ;;  %v2065_v8 = vld [vmem:[%s2348_s1 + $0x70] sm:$0xff]  ;;  %v84_v9 = vld [vmem:[%s2348_s1 + $0x18] sm:$0xff]  ;;  %v94_v10 = vld [vmem:[%s2348_s1 + $0x68] sm:$0xff] }
  0x2a   :  { %1484 = vmatpush3.msra.mxu0 %v115_v1  ;;  %v85_v11 = vld [vmem:[%s2348_s1 + $0x20] sm:$0xff]  ;;  %v349_v13 = vld [vmem:[#allocation2 + $0x78] sm:$0xff]  ;;  %v86_v14 = vld [vmem:[%s2348_s1 + $0x28] sm:$0xff] }
  0x2b   :  { %1485 = vmatprep.subr.mxu0 %v114_v3  ;;  %v93_v12 = vld [vmem:[%s2348_s1 + $0x60] sm:$0xff]  ;;  %v92_v15 = vld [vmem:[%s2348_s1 + $0x58] sm:$0xff]  ;;  %v87_v16 = vld [vmem:[%s2348_s1 + $0x30] sm:$0xff]  ;;  %1513 = vmatprep.subr.mxu1 %v349_v13 }
  0x2c   :  { %1486 = vmatpush3.msra.mxu0 %v114_v3  ;;  %v91_v17 = vld [vmem:[%s2348_s1 + $0x50] sm:$0xff]  ;;  %1514 = vmatpush3.msra.mxu1 %v349_v13  ;;  %v88_v19 = vld [vmem:[%s2348_s1 + $0x38] sm:$0xff]  ;;  %v90_v20 = vld [vmem:[%s2348_s1 + $0x48] sm:$0xff] }
  0x2d   :  { %1487 = vmatprep.subr.mxu0 %v113_v4  ;;  %v348_v18 = vld [vmem:[#allocation2 + $0x70] sm:$0xff]  ;;  %v89_v21 = vld [vmem:[%s2348_s1 + $0x40] sm:$0xff]  ;;  %v347_v22 = vld [vmem:[#allocation2 + $0x68] sm:$0xff] }
  0x2e   :  { %1488 = vmatpush3.msra.mxu0 %v113_v4  ;;  %1515 = vmatprep.subr.mxu1 %v348_v18  ;;  %v346_v23 = vld [vmem:[#allocation2 + $0x60] sm:$0xff]  ;;  %v345_v24 = vld [vmem:[#allocation2 + $0x58] sm:$0xff]  ;;  %v344_v25 = vld [vmem:[#allocation2 + $0x50] sm:$0xff] }
  0x2f   :  { %1490 = vmatmul.mubr.msk.f32.vlgmr.msra.gmra.mxu0 %vm124_vm0, %v2050_v5  ;;  %1569 = vmatprep.subr.mxu0 %v2055_v6  ;;  %v2125_v26 = vld [vmem:[%s2347_s0] sm:$0xff]  ;;  %v343_v27 = vld [vmem:[#allocation2 + $0x48] sm:$0xff]  ;;  %v2142_v30 = vld [vmem:[%s2347_s0 + $0x10] sm:$0xff] }
  0x30   :  { %1492 = vmatprep.mubr.msk.f32.mxu0 %vm124_vm0, %v2060_v7  ;;  %1570 = vmatpush3.msra.mxu0 %v2055_v6  ;;  %v2136_v28 = vld [vmem:[%s2347_s0 + $0x8] sm:$0xff]  ;;  %v342_v29 = vld [vmem:[#allocation2 + $0x40] sm:$0xff]  ;;  %v341_v31 = vld [vmem:[#allocation2 + $0x38] sm:$0xff] }
  0x31   :  { %1571 = vmatprep.subr.mxu0 %v2065_v8  ;;  %1516 = vmatpush3.msra.mxu1 %v348_v18  ;;  %v2150_v32 = vld [vmem:[%s2347_s0 + $0x18] sm:$0xff]  ;;  %v340_v33 = vld [vmem:[#allocation2 + $0x30] sm:$0xff]  ;;  %v2155_v34 = vld [vmem:[%s2347_s0 + $0x20] sm:$0xff] }
  0x32   :  { %1572 = vmatpush3.msra.mxu0 %v2065_v8  ;;  %1517 = vmatprep.subr.mxu1 %v347_v22  ;;  %v339_v35 = vld [vmem:[#allocation2 + $0x28] sm:$0xff]  ;;  %v338_v37 = vld [vmem:[#allocation2 + $0x20] sm:$0xff]  ;;  %v2167_v38 = vld [vmem:[%s2347_s0 + $0x30] sm:$0xff] }
  0x33   :  { %1493 = vmatmul.mubr.msk.f32.gmra.mxu0 %vm124_vm0, %v84_v9  ;;  %1573 = vmatprep.subr.mxu0 %v94_v10  ;;  %v2162_v36 = vld [vmem:[%s2347_s0 + $0x28] sm:$0xff]  ;;  %v2174_v39 = vld [vmem:[%s2347_s0 + $0x38] sm:$0xff]  ;;  %v2179_v40 = vld [vmem:[%s2347_s0 + $0x40] sm:$0xff] }
  0x34   :  { %1495 = vmatprep.mubr.msk.f32.mxu0 %vm124_vm0, %v85_v11  ;;  %1574 = vmatpush3.msra.mxu0 %v94_v10  ;;  %v2186_v41 = vld [vmem:[%s2347_s0 + $0x48] sm:$0xff]  ;;  %v2191_v42 = vld [vmem:[%s2347_s0 + $0x50] sm:$0xff]  ;;  %v2198_v43 = vld [vmem:[%s2347_s0 + $0x58] sm:$0xff] }
  0x35   :  { %1575 = vmatprep.subr.mxu0 %v93_v12  ;;  %1518 = vmatpush3.msra.mxu1 %v347_v22  ;;  %v2203_v44 = vld [vmem:[%s2347_s0 + $0x60] sm:$0xff]  ;;  %v2210_v45 = vld [vmem:[%s2347_s0 + $0x68] sm:$0xff]  ;;  %v2215_v46 = vld [vmem:[%s2347_s0 + $0x70] sm:$0xff] }
  0x36   :  { %1576 = vmatpush3.msra.mxu0 %v93_v12  ;;  %1519 = vmatprep.subr.mxu1 %v346_v23  ;;  %v2222_v47 = vld [vmem:[%s2347_s0 + $0x78] sm:$0xff]  ;;  %v336_v49 = vld [vmem:[#allocation2 + $0x10] sm:$0xff]  ;;  %v335_v50 = vld [vmem:[#allocation2 + $0x8] sm:$0xff] }
  0x37   :  { %1496 = vmatmul.mubr.msk.f32.gmra.mxu0 %vm124_vm0, %v86_v14  ;;  %1577 = vmatprep.subr.mxu0 %v92_v15  ;;  %v337_v48 = vld [vmem:[#allocation2 + $0x18] sm:$0xff]  ;;  %v334_v51 = vld [vmem:[#allocation2] sm:$0xff]  ;;  %v665_v0 = vld [vmem:[#allocation5 + $0x10] sm:$0xff] }
  0x38   :  { %1498 = vmatprep.mubr.msk.f32.mxu0 %vm124_vm0, %v87_v16  ;;  %1578 = vmatpush3.msra.mxu0 %v92_v15  ;;  %v666_v52 = vld [vmem:[#allocation5 + $0x18] sm:$0xff]  ;;  %v2228_v53 = vld [vmem:[%s2350_s3] ss:$0 sm:$0xff]  ;;  %v664_v3 = vld [vmem:[#allocation5 + $0x8] sm:$0xff] }
  0x39   :  { %1579 = vmatprep.subr.mxu0 %v91_v17  ;;  %1520 = vmatpush3.msra.mxu1 %v346_v23 }
  0x3a   :  { %1580 = vmatpush3.msra.mxu0 %v91_v17  ;;  %1521 = vmatprep.subr.mxu1 %v345_v24 }
  0x3b   :  { %1499 = vmatmul.mubr.msk.f32.gmra.mxu0 %vm124_vm0, %v88_v19  ;;  %1581 = vmatprep.subr.mxu0 %v90_v20 }
  0x3c   :  { %1501 = vmatprep.mubr.msk.f32.mxu0 %vm124_vm0, %v89_v21  ;;  %1582 = vmatpush3.msra.mxu0 %v90_v20 }
  0x3d   :  { %1583 = vmatprep.subr.mxu0 %v89_v21  ;;  %1522 = vmatpush3.msra.mxu1 %v345_v24 }
  0x3e   :  { %1584 = vmatpush3.msra.mxu0 %v89_v21  ;;  %1523 = vmatprep.subr.mxu1 %v344_v25 }
  0x3f   :  { %1502 = vmatmul.mubr.msk.f32.gmra.mxu0 %vm124_vm0, %v90_v20  ;;  %1585 = vmatprep.subr.mxu0 %v88_v19 }
  0x40   :  { %1504 = vmatprep.mubr.msk.f32.mxu0 %vm124_vm0, %v91_v17  ;;  %1586 = vmatpush3.msra.mxu0 %v88_v19 }
  0x41   :  { %1587 = vmatprep.subr.mxu0 %v87_v16  ;;  %1524 = vmatpush3.msra.mxu1 %v344_v25 }
  0x42   :  { %1588 = vmatpush3.msra.mxu0 %v87_v16  ;;  %1525 = vmatprep.subr.mxu1 %v343_v27 }
  0x43   :  { %1505 = vmatmul.mubr.msk.f32.gmra.mxu0 %vm124_vm0, %v92_v15  ;;  %1589 = vmatprep.subr.mxu0 %v86_v14 }
  0x44   :  { %1507 = vmatprep.mubr.msk.f32.mxu0 %vm124_vm0, %v93_v12  ;;  %1590 = vmatpush3.msra.mxu0 %v86_v14 }
  0x45   :  { %1591 = vmatprep.subr.mxu0 %v85_v11  ;;  %1526 = vmatpush3.msra.mxu1 %v343_v27 }
  0x46   :  { %1592 = vmatpush3.msra.mxu0 %v85_v11  ;;  %1527 = vmatprep.subr.mxu1 %v342_v29 }
  0x47   :  { %1508 = vmatmul.mubr.msk.f32.gmra.mxu0 %vm124_vm0, %v94_v10  ;;  %1593 = vmatprep.subr.mxu0 %v84_v9 }
  0x48   :  { %1510 = vmatprep.mubr.msk.f32.mxu0 %vm124_vm0, %v2065_v8  ;;  %1594 = vmatpush3.msra.mxu0 %v84_v9  ;;  %v663_v8 = vld [vmem:[#allocation5] sm:$0xff] }
  0x49   :  { %1595 = vmatprep.subr.mxu0 %v2060_v7  ;;  %1528 = vmatpush3.msra.mxu1 %v342_v29 }
  0x4a   :  { %1596 = vmatpush3.msra.mxu0 %v2060_v7  ;;  %1529 = vmatprep.subr.mxu1 %v341_v31 }
  0x4b   :  { %1511 = vmatmul.mubr.msk.f32.gmra.mxu0 %vm124_vm0, %v2055_v6  ;;  %1597 = vmatprep.subr.mxu0 %v2050_v5 }
  0x4c   :  { %1598 = vmatpush3.msra.mxu0 %v2050_v5  ;;  %1601 = vmatprep.mubr.f32.mxu0 %v2125_v26 }
  0x4d   :  { %1599 = vmatprep.subr.mxu0 %v2037_v2  ;;  %1530 = vmatpush3.msra.mxu1 %v341_v31 }
  0x4e   :  { %1600 = vmatpush3.msra.mxu0 %v2037_v2  ;;  %1531 = vmatprep.subr.mxu1 %v340_v33 }
  0x4f   :  { %1602 = vmatmul.mubr.f32.vlgmr.msra.gmra.mxu0 %v2136_v28  ;;  %1532 = vmatpush3.msra.mxu1 %v340_v33 }
  0x50   :  { %1604 = vmatprep.mubr.f32.mxu0 %v2142_v30  ;;  %1533 = vmatprep.subr.mxu1 %v339_v35 }
  0x51   :  { %1534 = vmatpush3.msra.mxu1 %v339_v35 }
  0x52   :  { %1535 = vmatprep.subr.mxu1 %v338_v37 }
  0x53   :  { %1605 = vmatmul.mubr.f32.gmra.mxu0 %v2150_v32  ;;  %1536 = vmatpush3.msra.mxu1 %v338_v37 }
  0x54   :  { %1607 = vmatprep.mubr.f32.mxu0 %v2155_v34  ;;  %1537 = vmatprep.subr.mxu1 %v337_v48 }
  0x55   :  { %1538 = vmatpush3.msra.mxu1 %v337_v48 }
  0x56   :  { %1539 = vmatprep.subr.mxu1 %v336_v49 }
  0x57   :  { %1608 = vmatmul.mubr.f32.gmra.mxu0 %v2162_v36  ;;  %1540 = vmatpush3.msra.mxu1 %v336_v49 }
  0x58   :  { %1610 = vmatprep.mubr.f32.mxu0 %v2167_v38  ;;  %1541 = vmatprep.subr.mxu1 %v335_v50 }
  0x59   :  { %1542 = vmatpush3.msra.mxu1 %v335_v50 }
  0x5a   :  { %1543 = vmatprep.subr.mxu1 %v334_v51 }
  0x5b   :  { %1611 = vmatmul.mubr.f32.gmra.mxu0 %v2174_v39  ;;  %1544 = vmatpush3.msra.mxu1 %v334_v51 }
  0x5c   :  { %1613 = vmatprep.mubr.f32.mxu0 %v2179_v40  ;;  %1625 = vmatprep.subr.mxu1 %v666_v52 }
  0x5f   :  { %1614 = vmatmul.mubr.f32.gmra.mxu0 %v2186_v41 }
  0x60   :  { %1616 = vmatprep.mubr.f32.mxu0 %v2191_v42 }
  0x63   :  { %1617 = vmatmul.mubr.f32.gmra.mxu0 %v2198_v43 }
  0x64   :  { %1619 = vmatprep.mubr.f32.mxu0 %v2203_v44 }
  0x67   :  { %1620 = vmatmul.mubr.f32.gmra.mxu0 %v2210_v45 }
  0x68   :  { %1622 = vmatprep.mubr.f32.mxu0 %v2215_v46 }
  0x6b   :  { %1623 = vmatmul.mubr.f32.gmra.mxu0 %v2222_v47 }
  0xef   :  { %v1491_v54 = vpop.f32.mrf.mxu0 }
  0xf0   :  { %v245_v55 = vadd.f32 %v1491_v54, %v2228_v53 }
  0xf1   :  { %v239_v56 = vpop.f32.mrf.mxu0 }
  0xf2   :  { %v240_v57 = vadd.f32 %v2228_v53, %v239_v56  ;;  %v319_v60 = vmax.f32 %v245_v55, 0.0 }
  0xf3   :  { %v1494_v58 = vpop.f32.mrf.mxu0 }
  0xf4   :  { %v318_v59 = vmax.f32 %v240_v57, 0.0  ;;  %v255_v61 = vadd.f32 %v1494_v58, %v2228_v53 }
  0xf5   :  { %v249_v62 = vpop.f32.mrf.mxu0 }
  0xf6   :  { %v250_v63 = vadd.f32 %v2228_v53, %v249_v62  ;;  %1545 = vmatprep.mubr.f32.mxu1 %v318_v59  ;;  %v321_v4 = vmax.f32 %v255_v61, 0.0 }
  0xf7   :  { %v1497_v1 = vpop.f32.mrf.mxu0  ;;  %1546 = vmatmul.mubr.f32.vlgmr.msra.gmra.mxu1 %v319_v60 }
  0xf8   :  { %v320_v2 = vmax.f32 %v250_v63, 0.0  ;;  %1626 = vmatpush3.msra.mxu1 %v666_v52  ;;  %v265_v5 = vadd.f32 %v1497_v1, %v2228_v53 }
  0xf9   :  { %v259_v6 = vpop.f32.mrf.mxu0  ;;  %1627 = vmatprep.subr.mxu1 %v665_v0 }
  0xfa   :  { %v260_v7 = vadd.f32 %v2228_v53, %v259_v6  ;;  %1548 = vmatprep.mubr.f32.mxu1 %v320_v2  ;;  %1628 = vmatpush3.msra.mxu1 %v665_v0  ;;  %v323_v11 = vmax.f32 %v265_v5, 0.0 }
  0xfb   :  { %v1500_v9 = vpop.f32.mrf.mxu0  ;;  %1549 = vmatmul.mubr.f32.gmra.mxu1 %v321_v4  ;;  %1629 = vmatprep.subr.mxu1 %v664_v3 }
  0xfc   :  { %v322_v10 = vmax.f32 %v260_v7, 0.0  ;;  %1630 = vmatpush3.msra.mxu1 %v664_v3  ;;  %v275_v12 = vadd.f32 %v1500_v9, %v2228_v53  ;;  %v914_v9 = vld [vmem:[#allocation7 + $0x78] sm:$0xff] }
  0xfd   :  { %v269_v13 = vpop.f32.mrf.mxu0  ;;  %1631 = vmatprep.subr.mxu1 %v663_v8  ;;  %1657 = vmatprep.subr.mxu0 %v914_v9 }
  0xfe   :  { %v270_v14 = vadd.f32 %v2228_v53, %v269_v13  ;;  %1551 = vmatprep.mubr.f32.mxu1 %v322_v10  ;;  %1632 = vmatpush3.msra.mxu1 %v663_v8  ;;  %v325_v17 = vmax.f32 %v275_v12, 0.0  ;;  %v913_v10 = vld [vmem:[#allocation7 + $0x70] sm:$0xff]  ;;  %v911_v12 = vld [vmem:[#allocation7 + $0x60] sm:$0xff]  ;;  %v910_v13 = vld [vmem:[#allocation7 + $0x58] sm:$0xff] }
  0xff   :  { %v1503_v15 = vpop.f32.mrf.mxu0  ;;  %1552 = vmatmul.mubr.f32.gmra.mxu1 %v323_v11  ;;  %1658 = vmatpush3.msra.mxu0 %v914_v9  ;;  %v912_v11 = vld [vmem:[#allocation7 + $0x68] sm:$0xff] }
 0x100   :  { %v324_v16 = vmax.f32 %v270_v14, 0.0  ;;  %v285_v18 = vadd.f32 %v1503_v15, %v2228_v53  ;;  %1659 = vmatprep.subr.mxu0 %v913_v10  ;;  %v909_v14 = vld [vmem:[#allocation7 + $0x50] sm:$0xff]  ;;  %v908_v15 = vld [vmem:[#allocation7 + $0x48] sm:$0xff] }
 0x101   :  { %v279_v19 = vpop.f32.mrf.mxu0  ;;  %1660 = vmatpush3.msra.mxu0 %v913_v10 }
 0x102   :  { %v280_v20 = vadd.f32 %v2228_v53, %v279_v19  ;;  %1554 = vmatprep.mubr.f32.mxu1 %v324_v16  ;;  %v327_v23 = vmax.f32 %v285_v18, 0.0  ;;  %1661 = vmatprep.subr.mxu0 %v912_v11  ;;  %v906_v16 = vld [vmem:[#allocation7 + $0x38] sm:$0xff]  ;;  %v904_v18 = vld [vmem:[#allocation7 + $0x28] sm:$0xff]  ;;  %v903_v19 = vld [vmem:[#allocation7 + $0x20] sm:$0xff] }
 0x103   :  { %v1506_v21 = vpop.f32.mrf.mxu0  ;;  %1555 = vmatmul.mubr.f32.gmra.mxu1 %v325_v17  ;;  %1662 = vmatpush3.msra.mxu0 %v912_v11  ;;  %v905_v17 = vld [vmem:[#allocation7 + $0x30] sm:$0xff] }
 0x104   :  { %v326_v22 = vmax.f32 %v280_v20, 0.0  ;;  %v295_v24 = vadd.f32 %v1506_v21, %v2228_v53  ;;  %1663 = vmatprep.subr.mxu0 %v911_v12  ;;  %v902_v20 = vld [vmem:[#allocation7 + $0x18] sm:$0xff]  ;;  %v901_v21 = vld [vmem:[#allocation7 + $0x10] sm:$0xff] }
 0x105   :  { %v289_v25 = vpop.f32.mrf.mxu0  ;;  %1664 = vmatpush3.msra.mxu0 %v911_v12 }
 0x106   :  { %v290_v27 = vadd.f32 %v2228_v53, %v289_v25  ;;  %1557 = vmatprep.mubr.f32.mxu1 %v326_v22  ;;  %v329_v33 = vmax.f32 %v295_v24, 0.0  ;;  %1665 = vmatprep.subr.mxu0 %v910_v13  ;;  %v900_v22 = vld [vmem:[#allocation7 + $0x8] sm:$0xff]  ;;  %v1294_v24 = vld [vmem:[%s2352_s5] ss:$0 sm:$0xff] }
 0x107   :  { %v1509_v29 = vpop.f32.mrf.mxu0  ;;  %1558 = vmatmul.mubr.f32.gmra.mxu1 %v327_v23  ;;  %1666 = vmatpush3.msra.mxu0 %v910_v13  ;;  %v899_v23 = vld [vmem:[#allocation7] sm:$0xff] }
 0x108   :  { %v328_v31 = vmax.f32 %v290_v27, 0.0  ;;  %v305_v35 = vadd.f32 %v1509_v29, %v2228_v53  ;;  %1667 = vmatprep.subr.mxu0 %v909_v14 }
 0x109   :  { %v299_v37 = vpop.f32.mrf.mxu0  ;;  %1668 = vmatpush3.msra.mxu0 %v909_v14 }
 0x10a   :  { %v300_v48 = vadd.f32 %v2228_v53, %v299_v37  ;;  %1560 = vmatprep.mubr.f32.mxu1 %v328_v31  ;;  %v331_v51 = vmax.f32 %v305_v35, 0.0  ;;  %1669 = vmatprep.subr.mxu0 %v908_v15 }
 0x10b   :  { %v1512_v49 = vpop.f32.mrf.mxu0  ;;  %1561 = vmatmul.mubr.f32.gmra.mxu1 %v329_v33  ;;  %1670 = vmatpush3.msra.mxu0 %v908_v15 }
 0x10c   :  { %v330_v50 = vmax.f32 %v300_v48, 0.0  ;;  %v315_v52 = vadd.f32 %v1512_v49, %v2228_v53 }
 0x10d   :  { %v309_v54 = vpop.f32.mrf.mxu0 }
 0x10e   :  { %v310_v55 = vadd.f32 %v2228_v53, %v309_v54  ;;  %1563 = vmatprep.mubr.f32.mxu1 %v330_v50  ;;  %v333_v58 = vmax.f32 %v315_v52, 0.0 }
 0x10f   :  { %1564 = vmatmul.mubr.f32.gmra.mxu1 %v331_v51  ;;  %v1603_v56 = vpop.f32.mrf.mxu0 }
 0x110   :  { %v332_v57 = vmax.f32 %v310_v55, 0.0 }
 0x111   :  { %v584_v59 = vpop.f32.mrf.mxu0 }
 0x112   :  { %1566 = vmatprep.mubr.f32.mxu1 %v332_v57 }
 0x113   :  { %1567 = vmatmul.mubr.f32.gmra.mxu1 %v333_v58  ;;  %v1606_v60 = vpop.f32.mrf.mxu0 }
 0x114   :  { %1633 = vmatprep.mubr.msk.f32.mxu1 %vm124_vm0, %v584_v59 }
 0x115   :  { %v594_v61 = vpop.f32.mrf.mxu0 }
 0x117   :  { %1634 = vmatmul.mubr.msk.f32.vlgmr.msra.gmra.mxu1 %vm124_vm0, %v1603_v56  ;;  %v1609_v62 = vpop.f32.mrf.mxu0 }
 0x118   :  { %1636 = vmatprep.mubr.msk.f32.mxu1 %vm124_vm0, %v594_v61 }
 0x119   :  { %v604_v63 = vpop.f32.mrf.mxu0 }
 0x11b   :  { %1637 = vmatmul.mubr.msk.f32.gmra.mxu1 %vm124_vm0, %v1606_v60  ;;  %v1612_v53 = vpop.f32.mrf.mxu0 }
 0x11c   :  { %1639 = vmatprep.mubr.msk.f32.mxu1 %vm124_vm0, %v604_v63 }
 0x11d   :  { %v614_v0 = vpop.f32.mrf.mxu0 }
 0x11f   :  { %1640 = vmatmul.mubr.msk.f32.gmra.mxu1 %vm124_vm0, %v1609_v62  ;;  %v1615_v1 = vpop.f32.mrf.mxu0 }
 0x120   :  { %1642 = vmatprep.mubr.msk.f32.mxu1 %vm124_vm0, %v614_v0 }
 0x121   :  { %v624_v2 = vpop.f32.mrf.mxu0 }
 0x123   :  { %1643 = vmatmul.mubr.msk.f32.gmra.mxu1 %vm124_vm0, %v1612_v53  ;;  %v1618_v3 = vpop.f32.mrf.mxu0 }
 0x124   :  { %1645 = vmatprep.mubr.msk.f32.mxu1 %vm124_vm0, %v624_v2 }
 0x125   :  { %v634_v4 = vpop.f32.mrf.mxu0 }
 0x127   :  { %1646 = vmatmul.mubr.msk.f32.gmra.mxu1 %vm124_vm0, %v1615_v1  ;;  %v1621_v5 = vpop.f32.mrf.mxu0 }
 0x128   :  { %1648 = vmatprep.mubr.msk.f32.mxu1 %vm124_vm0, %v634_v4 }
 0x129   :  { %v644_v6 = vpop.f32.mrf.mxu0 }
 0x12b   :  { %1649 = vmatmul.mubr.msk.f32.gmra.mxu1 %vm124_vm0, %v1618_v3  ;;  %v1624_v7 = vpop.f32.mrf.mxu0 }
 0x12c   :  { %1651 = vmatprep.mubr.msk.f32.mxu1 %vm124_vm0, %v644_v6 }
 0x12d   :  { %v654_v8 = vpop.f32.mrf.mxu0 }
 0x12f   :  { %1652 = vmatmul.mubr.msk.f32.gmra.mxu1 %vm124_vm0, %v1621_v5 }
 0x130   :  { %1654 = vmatprep.mubr.msk.f32.mxu1 %vm124_vm0, %v654_v8  ;;  %v2269_v8 = vld [vmem:[%s2354_s7] ss:$0 sm:$0xff]  ;;  %s1942_s7 = smov [#allocation8]  }
 0x131   :  { %s1233_s14 = sshll.u32 %s1942_s7, 4  ;;  %s1234_s14 = int_to_ptr.vmem [resolvable:$true] %s1233_s14 }
 0x132   :  { %s1869_s15 = scalar_lea.vmem %s1234_s14, 2048  ;;  %p1874_p2 = scmp.lt.s32.totalorder %s1234_s14, %s1234_s14 }
 0x133   :  { %1655 = vmatmul.mubr.msk.f32.gmra.mxu1 %vm124_vm0, %v1624_v7  ;;  %p1870_p1 = scmp.ne.s32.totalorder %s1234_s14, %s1869_s15  ;;  %p1875_p3 = scmp.lt.s32.totalorder %s1869_s15, %s1869_s15 }
 0x134   :  { %1754 = vmatprep.mubr.f32.mxu1 %v2167_v38  ;;  %v907_v38 = vld [vmem:[#allocation7 + $0x40] sm:$0xff] }
 0x135   :  { %1671 = vmatprep.subr.mxu0 %v907_v38  ;;  %p1876_p4 = por %p1875_p3, %p1874_p2 }
 0x136   :  { %1672 = vmatpush3.msra.mxu0 %v907_v38 }
 0x137   :  { %1673 = vmatprep.subr.mxu0 %v906_v16  ;;  %p1877_p5 = pnand %p1876_p4, %p1870_p1 }
 0x138   :  { %1674 = vmatpush3.msra.mxu0 %v906_v16 }
 0x139   :  { %1675 = vmatprep.subr.mxu0 %v905_v17 }
 0x13a   :  { %1676 = vmatpush3.msra.mxu0 %v905_v17 }
 0x13b   :  { %1677 = vmatprep.subr.mxu0 %v904_v18 }
 0x13c   :  { %1678 = vmatpush3.msra.mxu0 %v904_v18 }
 0x13d   :  { %1679 = vmatprep.subr.mxu0 %v903_v19 }
 0x13e   :  { %1680 = vmatpush3.msra.mxu0 %v903_v19 }
 0x13f   :  { %1681 = vmatprep.subr.mxu0 %v902_v20 }
 0x140   :  { %1682 = vmatpush3.msra.mxu0 %v902_v20 }
 0x141   :  { %1683 = vmatprep.subr.mxu0 %v901_v21 }
 0x142   :  { %1684 = vmatpush3.msra.mxu0 %v901_v21 }
 0x143   :  { %1685 = vmatprep.subr.mxu0 %v900_v22 }
 0x144   :  { %1686 = vmatpush3.msra.mxu0 %v900_v22 }
 0x145   :  { %1687 = vmatprep.subr.mxu0 %v899_v23 }
 0x146   :  { %1688 = vmatpush3.msra.mxu0 %v899_v23 }
 0x1b7   :  { %v1547_v25 = vpop.f32.mrf.mxu1 }
 0x1b8   :  { %v429_v27 = vadd.f32 %v1547_v25, %v1294_v24 }
 0x1b9   :  { %v423_v29 = vpop.f32.mrf.mxu1 }
 0x1ba   :  { %503 = vst [vmem:[#allocation8 + $0x8] sm:$0xff] %v429_v27  ;;  %v424_v31 = vadd.f32 %v1294_v24, %v423_v29 }
 0x1bb   :  { %v1550_v33 = vpop.f32.mrf.mxu1 }
 0x1bc   :  { %502 = vst [vmem:[#allocation8] sm:$0xff] %v424_v31  ;;  %v439_v35 = vadd.f32 %v1550_v33, %v1294_v24 }
 0x1bd   :  { %v433_v37 = vpop.f32.mrf.mxu1 }
 0x1be   :  { %505 = vst [vmem:[#allocation8 + $0x18] sm:$0xff] %v439_v35  ;;  %v434_v48 = vadd.f32 %v1294_v24, %v433_v37 }
 0x1bf   :  { %v1553_v49 = vpop.f32.mrf.mxu1 }
 0x1c0   :  { %504 = vst [vmem:[#allocation8 + $0x10] sm:$0xff] %v434_v48  ;;  %v449_v50 = vadd.f32 %v1553_v49, %v1294_v24 }
 0x1c1   :  { %v443_v51 = vpop.f32.mrf.mxu1 }
 0x1c2   :  { %507 = vst [vmem:[#allocation8 + $0x28] sm:$0xff] %v449_v50  ;;  %v444_v52 = vadd.f32 %v1294_v24, %v443_v51 }
 0x1c3   :  { %v1556_v54 = vpop.f32.mrf.mxu1 }
 0x1c4   :  { %506 = vst [vmem:[#allocation8 + $0x20] sm:$0xff] %v444_v52  ;;  %v459_v55 = vadd.f32 %v1556_v54, %v1294_v24 }
 0x1c5   :  { %v453_v56 = vpop.f32.mrf.mxu1 }
 0x1c6   :  { %509 = vst [vmem:[#allocation8 + $0x38] sm:$0xff] %v459_v55  ;;  %v454_v57 = vadd.f32 %v1294_v24, %v453_v56 }
 0x1c7   :  { %v1559_v58 = vpop.f32.mrf.mxu1 }
 0x1c8   :  { %508 = vst [vmem:[#allocation8 + $0x30] sm:$0xff] %v454_v57  ;;  %v469_v59 = vadd.f32 %v1559_v58, %v1294_v24 }
 0x1c9   :  { %v463_v60 = vpop.f32.mrf.mxu1 }
 0x1ca   :  { %511 = vst [vmem:[#allocation8 + $0x48] sm:$0xff] %v469_v59  ;;  %v464_v61 = vadd.f32 %v1294_v24, %v463_v60 }
 0x1cb   :  { %v1562_v62 = vpop.f32.mrf.mxu1 }
 0x1cc   :  { %510 = vst [vmem:[#allocation8 + $0x40] sm:$0xff] %v464_v61  ;;  %v479_v63 = vadd.f32 %v1562_v62, %v1294_v24 }
 0x1cd   :  { %v473_v53 = vpop.f32.mrf.mxu1 }
 0x1ce   :  { %513 = vst [vmem:[#allocation8 + $0x58] sm:$0xff] %v479_v63  ;;  %v474_v0 = vadd.f32 %v1294_v24, %v473_v53 }
 0x1cf   :  { %v1565_v1 = vpop.f32.mrf.mxu1 }
 0x1d0   :  { %512 = vst [vmem:[#allocation8 + $0x50] sm:$0xff] %v474_v0  ;;  %v489_v2 = vadd.f32 %v1565_v1, %v1294_v24 }
 0x1d1   :  { %v483_v3 = vpop.f32.mrf.mxu1 }
 0x1d2   :  { %515 = vst [vmem:[#allocation8 + $0x68] sm:$0xff] %v489_v2  ;;  %v484_v4 = vadd.f32 %v1294_v24, %v483_v3 }
 0x1d3   :  { %v1568_v5 = vpop.f32.mrf.mxu1 }
 0x1d4   :  { %514 = vst [vmem:[#allocation8 + $0x60] sm:$0xff] %v484_v4  ;;  %v499_v6 = vadd.f32 %v1568_v5, %v1294_v24 }
 0x1d5   :  { %v493_v7 = vpop.f32.mrf.mxu1 }
 0x1d6   :  { %517 = vst [vmem:[#allocation8 + $0x78] sm:$0xff] %v499_v6  ;;  %v494_v9 = vadd.f32 %v1294_v24, %v493_v7 }
 0x1d7   :  { %v1635_v10 = vpop.f32.mrf.mxu1 }
 0x1d8   :  { %516 = vst [vmem:[#allocation8 + $0x70] sm:$0xff] %v494_v9  ;;  %v794_v11 = vadd.f32 %v1635_v10, %v2269_v8 }
 0x1d9   :  { %v788_v12 = vpop.f32.mrf.mxu1 }
 0x1da   :  { %v868_v13 = vmax.f32 %v794_v11, 0.0  ;;  %v789_v14 = vadd.f32 %v2269_v8, %v788_v12 }
 0x1db   :  { %v1638_v15 = vpop.f32.mrf.mxu1 }
 0x1dc   :  { %884 = vst [vmem:[#allocation11 + $0x8] sm:$0xff] %v868_v13  ;;  %v867_v38 = vmax.f32 %v789_v14, 0.0  ;;  %v804_v16 = vadd.f32 %v1638_v15, %v2269_v8 }
 0x1dd   :  { %v798_v17 = vpop.f32.mrf.mxu1 }
 0x1de   :  { %883 = vst [vmem:[#allocation11] sm:$0xff] %v867_v38  ;;  %v870_v18 = vmax.f32 %v804_v16, 0.0  ;;  %v799_v19 = vadd.f32 %v2269_v8, %v798_v17  ;;  %1689 = vmatprep.mubr.f32.mxu0 %v867_v38 }
 0x1df   :  { %v1641_v20 = vpop.f32.mrf.mxu1  ;;  %1690 = vmatmul.mubr.f32.vlgmr.msra.gmra.mxu0 %v868_v13 }
 0x1e0   :  { %886 = vst [vmem:[#allocation11 + $0x18] sm:$0xff] %v870_v18  ;;  %v869_v21 = vmax.f32 %v799_v19, 0.0  ;;  %v814_v22 = vadd.f32 %v1641_v20, %v2269_v8 }
 0x1e1   :  { %v808_v23 = vpop.f32.mrf.mxu1 }
 0x1e2   :  { %885 = vst [vmem:[#allocation11 + $0x10] sm:$0xff] %v869_v21  ;;  %v872_v24 = vmax.f32 %v814_v22, 0.0  ;;  %v809_v25 = vadd.f32 %v2269_v8, %v808_v23  ;;  %1692 = vmatprep.mubr.f32.mxu0 %v869_v21 }
 0x1e3   :  { %v1644_v27 = vpop.f32.mrf.mxu1  ;;  %1693 = vmatmul.mubr.f32.gmra.mxu0 %v870_v18 }
 0x1e4   :  { %888 = vst [vmem:[#allocation11 + $0x28] sm:$0xff] %v872_v24  ;;  %v871_v29 = vmax.f32 %v809_v25, 0.0  ;;  %v824_v31 = vadd.f32 %v1644_v27, %v2269_v8 }
 0x1e5   :  { %v818_v33 = vpop.f32.mrf.mxu1 }
 0x1e6   :  { %887 = vst [vmem:[#allocation11 + $0x20] sm:$0xff] %v871_v29  ;;  %v874_v35 = vmax.f32 %v824_v31, 0.0  ;;  %v819_v37 = vadd.f32 %v2269_v8, %v818_v33  ;;  %1695 = vmatprep.mubr.f32.mxu0 %v871_v29 }
 0x1e7   :  { %v1647_v48 = vpop.f32.mrf.mxu1  ;;  %1696 = vmatmul.mubr.f32.gmra.mxu0 %v872_v24 }
 0x1e8   :  { %890 = vst [vmem:[#allocation11 + $0x38] sm:$0xff] %v874_v35  ;;  %v873_v49 = vmax.f32 %v819_v37, 0.0  ;;  %v834_v50 = vadd.f32 %v1647_v48, %v2269_v8 }
 0x1e9   :  { %v828_v51 = vpop.f32.mrf.mxu1 }
 0x1ea   :  { %889 = vst [vmem:[#allocation11 + $0x30] sm:$0xff] %v873_v49  ;;  %v876_v52 = vmax.f32 %v834_v50, 0.0  ;;  %v829_v54 = vadd.f32 %v2269_v8, %v828_v51  ;;  %1698 = vmatprep.mubr.f32.mxu0 %v873_v49 }
 0x1eb   :  { %v1650_v55 = vpop.f32.mrf.mxu1  ;;  %1699 = vmatmul.mubr.f32.gmra.mxu0 %v874_v35 }
 0x1ec   :  { %892 = vst [vmem:[#allocation11 + $0x48] sm:$0xff] %v876_v52  ;;  %v875_v56 = vmax.f32 %v829_v54, 0.0  ;;  %v844_v57 = vadd.f32 %v1650_v55, %v2269_v8 }
 0x1ed   :  { %v838_v58 = vpop.f32.mrf.mxu1 }
 0x1ee   :  { %891 = vst [vmem:[#allocation11 + $0x40] sm:$0xff] %v875_v56  ;;  %v878_v59 = vmax.f32 %v844_v57, 0.0  ;;  %v839_v60 = vadd.f32 %v2269_v8, %v838_v58  ;;  %1701 = vmatprep.mubr.f32.mxu0 %v875_v56 }
 0x1ef   :  { %v1653_v61 = vpop.f32.mrf.mxu1  ;;  %1702 = vmatmul.mubr.f32.gmra.mxu0 %v876_v52 }
 0x1f0   :  { %894 = vst [vmem:[#allocation11 + $0x58] sm:$0xff] %v878_v59  ;;  %v877_v62 = vmax.f32 %v839_v60, 0.0  ;;  %v854_v63 = vadd.f32 %v1653_v61, %v2269_v8 }
 0x1f1   :  { %v848_v53 = vpop.f32.mrf.mxu1 }
 0x1f2   :  { %893 = vst [vmem:[#allocation11 + $0x50] sm:$0xff] %v877_v62  ;;  %v880_v0 = vmax.f32 %v854_v63, 0.0  ;;  %v849_v1 = vadd.f32 %v2269_v8, %v848_v53  ;;  %1704 = vmatprep.mubr.f32.mxu0 %v877_v62 }
 0x1f3   :  { %v1656_v2 = vpop.f32.mrf.mxu1  ;;  %1705 = vmatmul.mubr.f32.gmra.mxu0 %v878_v59 }
 0x1f4   :  { %896 = vst [vmem:[#allocation11 + $0x68] sm:$0xff] %v880_v0  ;;  %v879_v3 = vmax.f32 %v849_v1, 0.0  ;;  %v864_v4 = vadd.f32 %v1656_v2, %v2269_v8 }
 0x1f5   :  { %v858_v5 = vpop.f32.mrf.mxu1 }
 0x1f6   :  { %895 = vst [vmem:[#allocation11 + $0x60] sm:$0xff] %v879_v3  ;;  %v882_v6 = vmax.f32 %v864_v4, 0.0  ;;  %v859_v7 = vadd.f32 %v2269_v8, %v858_v5  ;;  %1707 = vmatprep.mubr.f32.mxu0 %v879_v3 }
 0x1f7   :  { %1708 = vmatmul.mubr.f32.gmra.mxu0 %v880_v0 }
 0x1f8   :  { %898 = vst [vmem:[#allocation11 + $0x78] sm:$0xff] %v882_v6  ;;  %v881_v9 = vmax.f32 %v859_v7, 0.0 }
 0x1fa   :  { %897 = vst [vmem:[#allocation11 + $0x70] sm:$0xff] %v881_v9  ;;  %1710 = vmatprep.mubr.f32.mxu0 %v881_v9 }
 0x1fb   :  { %1711 = vmatmul.mubr.f32.gmra.mxu0 %v882_v6 }
 0x1fc   :  { %1745 = vmatprep.mubr.f32.mxu0 %v2125_v26 }
 0x29f   :  { %v2288_v10 = vpop.f32.mrf.mxu0 }
 0x2a1   :  { %v2290_v11 = vpop.f32.mrf.mxu0 }
 0x2a3   :  { %v2292_v12 = vpop.f32.mrf.mxu0 }
 0x2a5   :  { %v2294_v13 = vpop.f32.mrf.mxu0 }
 0x2a7   :  { %v1697_v14 = vpop.f32.mrf.mxu0 }
 0x2a9   :  { %v1001_v15 = vpop.f32.mrf.mxu0 }
 0x2ab   :  { %v1700_v8 = vpop.f32.mrf.mxu0 }
 0x2ad   :  { %v1011_v38 = vpop.f32.mrf.mxu0 }
 0x2af   :  { %v1703_v16 = vpop.f32.mrf.mxu0 }
 0x2b1   :  { %v1021_v17 = vpop.f32.mrf.mxu0 }
 0x2b3   :  { %v1706_v18 = vpop.f32.mrf.mxu0 }
 0x2b5   :  { %v1031_v19 = vpop.f32.mrf.mxu0 }
 0x2b7   :  { %v1709_v20 = vpop.f32.mrf.mxu0 }
 0x2b9   :  { %v1041_v21 = vpop.f32.mrf.mxu0 }
 0x2bb   :  { %v1712_v22 = vpop.f32.mrf.mxu0 }
 0x2bc   :  { %1713 = vmatprep.subr.mxu0 %v1712_v22  ;;  %1769 = vmatprep.subr.mxu1 %v1712_v22 }
 0x2bd   :  { %v1051_v26 = vpop.f32.mrf.mxu0  ;;  %1714 = vmatpush3.msra.mxu0 %v1712_v22  ;;  %1785 = vmatpush3.msra.mxu1 %v1712_v22 }
 0x2be   :  { %1715 = vmatprep.subr.mxu0 %v1051_v26  ;;  %1770 = vmatprep.subr.mxu1 %v1051_v26 }
 0x2bf   :  { %1716 = vmatpush3.msra.mxu0 %v1051_v26  ;;  %1786 = vmatpush3.msra.mxu1 %v1051_v26 }
 0x2c0   :  { %1717 = vmatprep.subr.mxu0 %v1709_v20  ;;  %1771 = vmatprep.subr.mxu1 %v1709_v20 }
 0x2c1   :  { %1718 = vmatpush3.msra.mxu0 %v1709_v20  ;;  %1787 = vmatpush3.msra.mxu1 %v1709_v20 }
 0x2c2   :  { %1719 = vmatprep.subr.mxu0 %v1041_v21  ;;  %1772 = vmatprep.subr.mxu1 %v1041_v21 }
 0x2c3   :  { %1720 = vmatpush3.msra.mxu0 %v1041_v21  ;;  %1788 = vmatpush3.msra.mxu1 %v1041_v21 }
 0x2c4   :  { %1721 = vmatprep.subr.mxu0 %v1706_v18  ;;  %1773 = vmatprep.subr.mxu1 %v1706_v18 }
 0x2c5   :  { %1722 = vmatpush3.msra.mxu0 %v1706_v18  ;;  %1789 = vmatpush3.msra.mxu1 %v1706_v18 }
 0x2c6   :  { %1723 = vmatprep.subr.mxu0 %v1031_v19  ;;  %1774 = vmatprep.subr.mxu1 %v1031_v19 }
 0x2c7   :  { %1724 = vmatpush3.msra.mxu0 %v1031_v19  ;;  %1790 = vmatpush3.msra.mxu1 %v1031_v19 }
 0x2c8   :  { %1725 = vmatprep.subr.mxu0 %v1703_v16  ;;  %1775 = vmatprep.subr.mxu1 %v1703_v16 }
 0x2c9   :  { %1726 = vmatpush3.msra.mxu0 %v1703_v16  ;;  %1791 = vmatpush3.msra.mxu1 %v1703_v16 }
 0x2ca   :  { %1727 = vmatprep.subr.mxu0 %v1021_v17  ;;  %1776 = vmatprep.subr.mxu1 %v1021_v17 }
 0x2cb   :  { %1728 = vmatpush3.msra.mxu0 %v1021_v17  ;;  %1792 = vmatpush3.msra.mxu1 %v1021_v17 }
 0x2cc   :  { %1729 = vmatprep.subr.mxu0 %v1700_v8  ;;  %1777 = vmatprep.subr.mxu1 %v1700_v8 }
 0x2cd   :  { %1730 = vmatpush3.msra.mxu0 %v1700_v8  ;;  %1793 = vmatpush3.msra.mxu1 %v1700_v8 }
 0x2ce   :  { %1731 = vmatprep.subr.mxu0 %v1011_v38  ;;  %1778 = vmatprep.subr.mxu1 %v1011_v38 }
 0x2cf   :  { %1732 = vmatpush3.msra.mxu0 %v1011_v38  ;;  %1794 = vmatpush3.msra.mxu1 %v1011_v38 }
 0x2d0   :  { %1733 = vmatprep.subr.mxu0 %v1697_v14  ;;  %1779 = vmatprep.subr.mxu1 %v1697_v14 }
 0x2d1   :  { %1734 = vmatpush3.msra.mxu0 %v1697_v14  ;;  %1795 = vmatpush3.msra.mxu1 %v1697_v14 }
 0x2d2   :  { %1735 = vmatprep.subr.mxu0 %v1001_v15  ;;  %1780 = vmatprep.subr.mxu1 %v1001_v15 }
 0x2d3   :  { %1736 = vmatpush3.msra.mxu0 %v1001_v15  ;;  %1796 = vmatpush3.msra.mxu1 %v1001_v15 }
 0x2d4   :  { %1737 = vmatprep.subr.mxu0 %v2292_v12  ;;  %1781 = vmatprep.subr.mxu1 %v2292_v12 }
 0x2d5   :  { %1738 = vmatpush3.msra.mxu0 %v2292_v12  ;;  %1797 = vmatpush3.msra.mxu1 %v2292_v12 }
 0x2d6   :  { %1739 = vmatprep.subr.mxu0 %v2294_v13  ;;  %1782 = vmatprep.subr.mxu1 %v2294_v13 }
 0x2d7   :  { %1740 = vmatpush3.msra.mxu0 %v2294_v13  ;;  %1798 = vmatpush3.msra.mxu1 %v2294_v13 }
 0x2d8   :  { %1741 = vmatprep.subr.mxu0 %v2288_v10  ;;  %1783 = vmatprep.subr.mxu1 %v2288_v10 }
 0x2d9   :  { %1742 = vmatpush3.msra.mxu0 %v2288_v10  ;;  %1799 = vmatpush3.msra.mxu1 %v2288_v10 }
 0x2da   :  { %1743 = vmatprep.subr.mxu0 %v2290_v11  ;;  %1784 = vmatprep.subr.mxu1 %v2290_v11 }
 0x2db   :  { %1744 = vmatpush3.msra.mxu0 %v2290_v11  ;;  %1800 = vmatpush3.msra.mxu1 %v2290_v11 }
 0x2dc   :  { %1755 = vmatmul.mubr.f32.vlgmr.msra.gmra.mxu1 %v2174_v39  ;;  %1746 = vmatmul.mubr.f32.vlgmr.msra.gmra.mxu0 %v2136_v28 }
 0x2dd   :  { %1757 = vmatprep.mubr.f32.mxu1 %v2179_v40  ;;  %1748 = vmatprep.mubr.f32.mxu0 %v2142_v30 }
 0x2e0   :  { %1758 = vmatmul.mubr.f32.gmra.mxu1 %v2186_v41  ;;  %1749 = vmatmul.mubr.f32.gmra.mxu0 %v2150_v32 }
 0x2e1   :  { %1760 = vmatprep.mubr.f32.mxu1 %v2191_v42  ;;  %1751 = vmatprep.mubr.f32.mxu0 %v2155_v34 }
 0x2e4   :  { %1761 = vmatmul.mubr.f32.gmra.mxu1 %v2198_v43  ;;  %1752 = vmatmul.mubr.f32.gmra.mxu0 %v2162_v36 }
 0x2e5   :  { %1763 = vmatprep.mubr.f32.mxu1 %v2203_v44 }
 0x2e8   :  { %1764 = vmatmul.mubr.f32.gmra.mxu1 %v2210_v45 }
 0x2e9   :  { %1766 = vmatprep.mubr.f32.mxu1 %v2215_v46 }
 0x2ec   :  { %1767 = vmatmul.mubr.f32.gmra.mxu1 %v2222_v47 }
 0x2ed   :  { %1880 = shalt.err (!%p1877_p5)
}
 0x2ee   :  { %1239 = dma.vmem_to_hbm [thread:$0]  %s1234_s14, 2048, %s2357_s10, [#allocation4], %s1939_s26, %s1939_s26, %s1940_s27  }
 0x2ef   :  { %v1312_v28 = vld [vmem:[%s2356_s9] ss:$0 sm:$0xff]  ;;  %s1943_s9 = smov [#allocation9]   ;;  %s1944_s18 = smov [#allocation11]  }
 0x2f0   :  { %s1245_s10 = sshll.u32 %s1943_s9, 4  ;;  %s1257_s1 = sshll.u32 %s1944_s18, 4  ;;  %s1246_s10 = int_to_ptr.vmem [resolvable:$true] %s1245_s10  ;;  %s1258_s1 = int_to_ptr.vmem [resolvable:$true] %s1257_s1 }
 0x2f1   :  { %s1889_s4 = scalar_lea.vmem %s1246_s10, 2048  ;;  %p1894_p7 = scmp.lt.s32.totalorder %s1246_s10, %s1246_s10 }
 0x2f2   :  { %p1890_p6 = scmp.ne.s32.totalorder %s1246_s10, %s1889_s4  ;;  %p1895_p8 = scmp.lt.s32.totalorder %s1889_s4, %s1889_s4 }
 0x2f4   :  { %p1896_p9 = por %p1895_p8, %p1894_p7 }
 0x2f6   :  { %p1897_p10 = pnand %p1896_p9, %p1890_p6 }
 0x39c   :  { %v1756_v30 = vpop.f32.mrf.mxu1  ;;  %v1747_v32 = vpop.f32.mrf.mxu0 }
 0x39d   :  { %v1169_v34 = vadd.f32 %v1756_v30, %v1312_v28  ;;  %v1139_v36 = vadd.f32 %v1747_v32, %v1312_v28 }
 0x39e   :  { %v1163_v39 = vpop.f32.mrf.mxu1  ;;  %v1133_v40 = vpop.f32.mrf.mxu0 }
 0x39f   :  { %1219 = vst [vmem:[#allocation9 + $0x38] sm:$0xff] %v1169_v34  ;;  %v1164_v41 = vadd.f32 %v1312_v28, %v1163_v39  ;;  %1213 = vst [vmem:[#allocation9 + $0x8] sm:$0xff] %v1139_v36  ;;  %v1134_v42 = vadd.f32 %v1312_v28, %v1133_v40 }
 0x3a0   :  { %v1759_v43 = vpop.f32.mrf.mxu1  ;;  %v1750_v44 = vpop.f32.mrf.mxu0 }
 0x3a1   :  { %1218 = vst [vmem:[#allocation9 + $0x30] sm:$0xff] %v1164_v41  ;;  %v1179_v45 = vadd.f32 %v1759_v43, %v1312_v28  ;;  %1212 = vst [vmem:[#allocation9] sm:$0xff] %v1134_v42  ;;  %v1149_v46 = vadd.f32 %v1750_v44, %v1312_v28 }
 0x3a2   :  { %v1173_v47 = vpop.f32.mrf.mxu1  ;;  %v1143_v23 = vpop.f32.mrf.mxu0 }
 0x3a3   :  { %1221 = vst [vmem:[#allocation9 + $0x48] sm:$0xff] %v1179_v45  ;;  %v1174_v24 = vadd.f32 %v1312_v28, %v1173_v47  ;;  %1215 = vst [vmem:[#allocation9 + $0x18] sm:$0xff] %v1149_v46  ;;  %v1144_v25 = vadd.f32 %v1312_v28, %v1143_v23 }
 0x3a4   :  { %v1762_v27 = vpop.f32.mrf.mxu1  ;;  %v1753_v29 = vpop.f32.mrf.mxu0 }
 0x3a5   :  { %1220 = vst [vmem:[#allocation9 + $0x40] sm:$0xff] %v1174_v24  ;;  %v1189_v31 = vadd.f32 %v1762_v27, %v1312_v28  ;;  %1214 = vst [vmem:[#allocation9 + $0x10] sm:$0xff] %v1144_v25  ;;  %v1159_v33 = vadd.f32 %v1753_v29, %v1312_v28 }
 0x3a6   :  { %v1183_v35 = vpop.f32.mrf.mxu1  ;;  %v1153_v37 = vpop.f32.mrf.mxu0 }
 0x3a7   :  { %1223 = vst [vmem:[#allocation9 + $0x58] sm:$0xff] %v1189_v31  ;;  %v1184_v48 = vadd.f32 %v1312_v28, %v1183_v35  ;;  %1217 = vst [vmem:[#allocation9 + $0x28] sm:$0xff] %v1159_v33  ;;  %v1154_v49 = vadd.f32 %v1312_v28, %v1153_v37 }
 0x3a8   :  { %v1765_v50 = vpop.f32.mrf.mxu1 }
 0x3a9   :  { %1222 = vst [vmem:[#allocation9 + $0x50] sm:$0xff] %v1184_v48  ;;  %v1199_v51 = vadd.f32 %v1765_v50, %v1312_v28  ;;  %1216 = vst [vmem:[#allocation9 + $0x20] sm:$0xff] %v1154_v49 }
 0x3aa   :  { %v1193_v52 = vpop.f32.mrf.mxu1 }
 0x3ab   :  { %1225 = vst [vmem:[#allocation9 + $0x68] sm:$0xff] %v1199_v51  ;;  %v1194_v54 = vadd.f32 %v1312_v28, %v1193_v52 }
 0x3ac   :  { %v1768_v55 = vpop.f32.mrf.mxu1 }
 0x3ad   :  { %1224 = vst [vmem:[#allocation9 + $0x60] sm:$0xff] %v1194_v54  ;;  %v1209_v56 = vadd.f32 %v1768_v55, %v1312_v28 }
 0x3ae   :  { %v1203_v57 = vpop.f32.mrf.mxu1 }
 0x3af   :  { %1227 = vst [vmem:[#allocation9 + $0x78] sm:$0xff] %v1209_v56  ;;  %v1204_v58 = vadd.f32 %v1312_v28, %v1203_v57 }
 0x3b1   :  { %1226 = vst [vmem:[#allocation9 + $0x70] sm:$0xff] %v1204_v58 }
 0x3b2   :  { %1900 = shalt.err (!%p1897_p10)
}
 0x3b3   :  { %1251 = dma.vmem_to_hbm [thread:$0]  %s1246_s10, 2048, %s2358_s11, [#allocation10], %s1939_s26, %s1939_s26, %s1940_s27  }
 0x3b4   :  { %s1909_s21 = scalar_lea.vmem %s1258_s1, 2048  ;;  %p1914_p12 = scmp.lt.s32.totalorder %s1258_s1, %s1258_s1 }
 0x3b5   :  { %p1910_p11 = scmp.ne.s32.totalorder %s1258_s1, %s1909_s21  ;;  %p1915_p13 = scmp.lt.s32.totalorder %s1909_s21, %s1909_s21 }
 0x3b7   :  { %p1916_p0 = por %p1915_p13, %p1914_p12 }
 0x3b9   :  { %p1917_p1 = pnand %p1916_p0, %p1910_p11 }
 0x3bb   :  { %1920 = shalt.err (!%p1917_p1)
}
 0x3bc   :  { %1263 = dma.vmem_to_hbm [thread:$0]  %s1258_s1, 2048, %s2359_s12, [#allocation10], %s1939_s26, %s1939_s26, %s1940_s27  }
 0x3bd   :  { %1933 = dma.done.wait [#allocation4], 2048  }
 0x3be   :  { %1934 = vsyncadd [#allocation4], 4294965248 }
 0x3bf   :  { %1935 = dma.done.wait [#allocation10], 4096  }
 0x3c0   :  { %1936 = vsyncadd [#allocation10], 4294963200 }
 0x3c1   :  { %1273 = vsyncpa [#allocation3], 1 }
 0x3c2   :  { %1274 = vsyncpa [#allocation6], 1 }
 0x3c3   :  { %1275 = vsyncpa [#allocation4], 1 }
 0x3c4   :  { %1276 = vsyncpa [#allocation10], 1 }

</bundles_post_ra>
